<compile_context>
chip_gen: v6e
topology: v6e:2x2x1
jax: 0.10.0
libtpu: 0.0.40
codegen_flags: <defaults>
</compile_context>

<pallas_src>
import jax
import jax.numpy as jnp
from jax.experimental import pallas as pl
from jax.experimental.pallas import tpu as pltpu

_LANE = 128     # lane width (last-dim granularity)
_SUBLANE = 8    # sublane granularity (second-to-last dim, fp32)


def _round_up(x, m):
    return ((x + m - 1) // m) * m


# ----------------------------------------------------------------------------
# Pallas kernel: y = x @ W + b
#   x: (tm, Hp) bf16, W: (Hp, tn) bf16, b: (1, tn) f32  ->  y: (tm, tn) f32
# ----------------------------------------------------------------------------
def _fc_kernel(x_ref, w_ref, b_ref, o_ref):
    acc = jnp.dot(x_ref[...], w_ref[...], preferred_element_type=jnp.float32)
    o_ref[...] = (acc + b_ref[...]).astype(o_ref.dtype)


def fc_linear(x, w, b, *, max_tm=512, max_tn=512, compute_dtype=jnp.bfloat16):
    """Apply Linear(hidden_size, word_emb_size) to x of shape (B, S, H).

    x : (B, S, H) float32
    w : (H, E)    float32   (already transposed vs. torch's (E, H) weight)
    b : (E,)      float32
    returns (B, S, E) float32
    """
    B, S, H = x.shape
    E = w.shape[1]
    M = B * S

    # ---- lane-dense padded sizes --------------------------------------------
    Hp = _round_up(H, _LANE)
    Ep = _round_up(E, _LANE)

    # ---- tile / grid selection ----------------------------------------------
    gm = pl.cdiv(_round_up(M, _SUBLANE), max_tm)
    tm = _round_up(pl.cdiv(M, gm), _SUBLANE)
    Mp = gm * tm

    gn = pl.cdiv(Ep, max_tn)
    tn = _round_up(pl.cdiv(Ep, gn), _LANE)
    Epad = gn * tn

    # ---- pad & cast inputs ---------------------------------------------------
    x2 = x.reshape(M, H)
    x2 = jnp.pad(x2, ((0, Mp - M), (0, Hp - H))).astype(compute_dtype)
    wp = jnp.pad(w, ((0, Hp - H), (0, Epad - E))).astype(compute_dtype)
    bp = jnp.pad(b.astype(jnp.float32).reshape(1, E), ((0, 0), (0, Epad - E)))

    # ---- explicit VMEM budget (v5e default scoped limit is 16 MiB;
    #      v7x physical VMEM is 64 MiB) ---------------------------------------
    in_bytes = jnp.dtype(compute_dtype).itemsize
    est = (2 * tm * Hp * in_bytes      # x tile, double-buffered
           + 2 * Hp * tn * in_bytes    # weight tile, double-buffered
           + 2 * tn * 4                # bias tile, double-buffered
           + 2 * tm * tn * 4)          # fp32 output tile, double-buffered
    vmem_limit = int(min(64 * 1024 * 1024, max(32 * 1024 * 1024, 2 * est)))

    grid = (gm, gn)

    in_specs = [
        pl.BlockSpec((tm, Hp), lambda i, j: (i, 0)),   # activations
        pl.BlockSpec((Hp, tn), lambda i, j: (0, j)),   # weight
        pl.BlockSpec((1, tn), lambda i, j: (0, j)),    # bias
    ]
    out_spec = pl.BlockSpec((tm, tn), lambda i, j: (i, j))

    # TODO(synk): if H ever grows so large that one (Hp, tn) weight tile plus the
    # activation tile exceeds VMEM, add a K (H) reduction grid axis with an fp32
    # accumulator scratch (pl.when init/finalize) instead of shrinking tm/tn.
    y2 = pl.pallas_call(
        _fc_kernel,
        out_shape=jax.ShapeDtypeStruct((Mp, Epad), jnp.float32),
        grid_spec=pltpu.PrefetchScalarGridSpec(
            num_scalar_prefetch=0,
            grid=grid,
            in_specs=in_specs,
            out_specs=out_spec,
        ),
        compiler_params=pltpu.CompilerParams(
            dimension_semantics=("parallel", "parallel"),
            vmem_limit_bytes=vmem_limit,
        ),
    )(x2, wp, bp)

    return y2[:M, :E].reshape(B, S, E)


# ----------------------------------------------------------------------------
# EncoderWrapper in JAX
# ----------------------------------------------------------------------------
class EncoderWrapperJax:
    def __init__(self, hidden_size, word_emb_size, vocab_size, key):
        k_emb, k_w, k_b = jax.random.split(key, 3)
        # TODO(synk): the wrapped `self.model` is an arbitrary external encoder;
        # a deterministic embedding-lookup stand-in is used here (plain JAX).
        self.embedding = jax.random.normal(
            k_emb, (vocab_size, hidden_size), dtype=jnp.float32
        ) * 0.02
        # torch.nn.Linear(hidden_size, word_emb_size): weight (E, H), bias (E,)
        bound = 1.0 / jnp.sqrt(hidden_size)
        w_torch = jax.random.uniform(
            k_w, (word_emb_size, hidden_size), dtype=jnp.float32,
            minval=-bound, maxval=bound,
        )
        self.fc_w = w_torch.T                      # (H, E) for x @ W
        self.fc_b = jax.random.uniform(
            k_b, (word_emb_size,), dtype=jnp.float32, minval=-bound, maxval=bound
        )

    def model(self, input_ids):
        # stand-in encoder: token embedding lookup -> (B, S, H)
        ids = input_ids["input_ids"]
        return jnp.take(self.embedding, ids, axis=0)

    def forward(self, input_ids=None, **kwargs):
        # (.to(device) of dict values is implicit in JAX)
        output = self.model(input_ids)                       # (B, S, H)
        output = fc_linear(output, self.fc_w, self.fc_b)     # (B, S, E) — Pallas
        return {
            "last_hidden_state": output,
            "hidden_states": None,
            "attentions": None,
        }

    def get_output_embeddings(self):
        return None


# ----------------------------------------------------------------------------
# Demo / correctness check
# ----------------------------------------------------------------------------
if __name__ == "__main__":
    key = jax.random.PRNGKey(0)
    k_params, k_ids = jax.random.split(key)

    B, S = 2, 9          # M = 18 -> exercises the row-padding path (not /8, not /128)
    hidden_size = 32     # padded to 128 lanes inside the kernel
    word_emb_size = 64   # padded to 128 lanes inside the kernel
    vocab_size = 100

    wrapper = EncoderWrapperJax(hidden_size, word_emb_size, vocab_size, k_params)

    ids = jax.random.randint(k_ids, (B, S), 0, vocab_size, dtype=jnp.int32)
    input_ids = {"input_ids": ids}

    out = wrapper.forward(input_ids=input_ids)
    last_hidden = jax.block_until_ready(out["last_hidden_state"])

    # reference in plain JAX (same bf16 input rounding, fp32 accumulation)
    enc = wrapper.model(input_ids)
    xb = enc.astype(jnp.bfloat16).astype(jnp.float32)
    wb = wrapper.fc_w.astype(jnp.bfloat16).astype(jnp.float32)
    ref = jnp.einsum("bsh,he->bse", xb, wb,
                     preferred_element_type=jnp.float32) + wrapper.fc_b

    assert last_hidden.shape == (B, S, word_emb_size)
    assert last_hidden.dtype == jnp.float32
    assert jnp.allclose(last_hidden, ref, atol=2e-3, rtol=2e-3)

    print("KERNEL_OK")
</pallas_src>

<mosaic_0001>
module attributes {stable_mosaic.version = 11 : i64} {
  func.func @_fc_kernel(%arg0: i32, %arg1: i32, %arg2: memref<24x128xbf16, #tpu.memory_space<vmem>>, %arg3: memref<128x128xbf16, #tpu.memory_space<vmem>>, %arg4: memref<1x128xf32, #tpu.memory_space<vmem>>, %arg5: memref<24x128xf32, #tpu.memory_space<vmem>>) attributes {dimension_semantics = [#tpu.dimension_semantics<parallel>, #tpu.dimension_semantics<parallel>], iteration_bounds = array<i64: 1, 1>, scalar_prefetch = 0 : i64, scratch_operands = 0 : i64, tpu.core_type = #tpu.core_type<tc>, window_params = [{transform_indices = @transform_0, window_bounds = array<i64: 24, 128>}, {transform_indices = @transform_1, window_bounds = array<i64: 128, 128>}, {transform_indices = @transform_2, window_bounds = array<i64: 1, 128>}, {transform_indices = @transform_3, window_bounds = array<i64: 24, 128>}]} {
    %c0 = arith.constant 0 : index
    %c0_0 = arith.constant 0 : index
    %0 = vector.load %arg2[%c0, %c0_0] : memref<24x128xbf16, #tpu.memory_space<vmem>>, vector<24x128xbf16>
    %c0_1 = arith.constant 0 : index
    %c0_2 = arith.constant 0 : index
    %1 = vector.load %arg3[%c0_1, %c0_2] : memref<128x128xbf16, #tpu.memory_space<vmem>>, vector<128x128xbf16>
    %cst = arith.constant dense<0.000000e+00> : vector<24x128xf32>
    %2 = tpu.matmul %0, %1, %cst {dimension_numbers = #tpu.dot_dimension_numbers<[1], [0], [0], [1], [0, 0, 1, 1], [], []>} : vector<24x128xbf16>, vector<128x128xbf16>, vector<24x128xf32> -> vector<24x128xf32>
    %c0_3 = arith.constant 0 : index
    %c0_4 = arith.constant 0 : index
    %3 = vector.load %arg4[%c0_3, %c0_4] : memref<1x128xf32, #tpu.memory_space<vmem>>, vector<1x128xf32>
    %4 = vector.broadcast %3 : vector<1x128xf32> to vector<24x128xf32>
    %5 = arith.addf %2, %4 : vector<24x128xf32>
    %c0_5 = arith.constant 0 : index
    %c0_6 = arith.constant 0 : index
    %6 = vector.load %arg5[%c0_5, %c0_6] : memref<24x128xf32, #tpu.memory_space<vmem>>, vector<24x128xf32>
    tpu.vector_store %arg5[%c0_5, %c0_6], %5 {strides = array<i32>} : memref<24x128xf32, #tpu.memory_space<vmem>>, vector<24x128xf32>,
    return
  }
  func.func @transform_0(%arg0: i32, %arg1: i32) -> (i32, i32) {
    %c0_i32 = arith.constant 0 : i32
    %c0_i32_0 = arith.constant 0 : i32
    return %arg0, %c0_i32 : i32, i32
  }
  func.func @transform_1(%arg0: i32, %arg1: i32) -> (i32, i32) {
    %c0_i32 = arith.constant 0 : i32
    %c0_i32_0 = arith.constant 0 : i32
    return %c0_i32, %arg1 : i32, i32
  }
  func.func @transform_2(%arg0: i32, %arg1: i32) -> (i32, i32) {
    %c0_i32 = arith.constant 0 : i32
    %c0_i32_0 = arith.constant 0 : i32
    return %c0_i32, %arg1 : i32, i32
  }
  func.func @transform_3(%arg0: i32, %arg1: i32) -> (i32, i32) {
    %c0_i32 = arith.constant 0 : i32
    return %arg0, %arg1 : i32, i32
  }
}

</mosaic_0001>

<bundles_post_ra>
// kernel: tpu_custom_call.1
= control target key start
LH: loop header
LB: loop body
LE: loop exit
PB: predicated region body
PF: predicated region fallthrough
CT: control target
= control target key end

     0   :  { %8 = vsyncpa [#allocation3], 0  ;;  %s360_s0 = inlined_call_operand.hbm [shape: bf16[24,128], index: 0, kind: input, shape index: {}]   ;;  %s361_s1 = inlined_call_operand.hbm [shape: bf16[128,128], index: 1, kind: input, shape index: {}]   ;;  %s362_s2 = inlined_call_operand.vmem [shape: f32[1,128], index: 2, kind: input, shape index: {}]   ;;  %s363_s3 = inlined_call_operand.hbm [shape: f32[24,128], index: 3, kind: output, shape index: {}]  }
   0x1   :  { %9 = vsyncpa [#allocation6], 0 }
   0x2   :  { %10 = vsyncpa [#allocation4], 0  ;;  %s321_s12 = smov [#allocation2]  }
   0x3   :  { %s16_s13 = sshll.u32 %s321_s12, 4  ;;  %s17_s13 = int_to_ptr.vmem [resolvable:$true] %s16_s13 }
   0x4   :  { %s263_s14 = scalar_lea.vmem %s17_s13, 192  ;;  %p268_p1 = scmp.lt.s32.totalorder %s17_s13, %s17_s13 }
   0x5   :  { %p264_p0 = scmp.ne.s32.totalorder %s17_s13, %s263_s14  ;;  %p269_p2 = scmp.lt.s32.totalorder %s263_s14, %s263_s14 }
   0x7   :  { %p270_p3 = por %p269_p2, %p268_p1 }
   0x9   :  { %p271_p4 = pnand %p270_p3, %p264_p0 }
   0xb   :  { %274 = shalt.err (!%p271_p4)
}
   0xc   :  { %s322_s15 = smov 64   ;;  %s323_s16 = smov 4  }
   0xd   :  { %22 = dma.hbm_to_vmem [thread:$0]  %s360_s0, 192, %s17_s13, [#allocation3], %s322_s15, %s322_s15, %s323_s16  }
   0xe   :  { %s324_s19 = smov [#allocation5]  }
   0xf   :  { %s28_s20 = sshll.u32 %s324_s19, 4  ;;  %s29_s20 = int_to_ptr.vmem [resolvable:$true] %s28_s20 }
  0x10   :  { %s283_s21 = scalar_lea.vmem %s29_s20, 1024  ;;  %p288_p6 = scmp.lt.s32.totalorder %s29_s20, %s29_s20 }
  0x11   :  { %p284_p5 = scmp.ne.s32.totalorder %s29_s20, %s283_s21  ;;  %p289_p7 = scmp.lt.s32.totalorder %s283_s21, %s283_s21 }
  0x13   :  { %p290_p8 = por %p289_p7, %p288_p6 }
  0x15   :  { %p291_p9 = pnand %p290_p8, %p284_p5 }
  0x17   :  { %294 = shalt.err (!%p291_p9)
}
  0x18   :  { %34 = dma.hbm_to_vmem [thread:$0]  %s361_s1, 1024, %s29_s20, [#allocation6], %s322_s15, %s322_s15, %s323_s16  }
  0x19   :  { %315 = dma.done.wait [#allocation3], 192  }
  0x1a   :  { %316 = vsyncadd [#allocation3], 4294967104 }
  0x1b   :  { %317 = dma.done.wait [#allocation6], 1024  }
  0x1c   :  { %318 = vsyncadd [#allocation6], 4294966272  ;;  %v245_v0 = vld [vmem:[#allocation5 + $0x38] sm:$0xff]   ;;  %v246_v1 = vld [vmem:[#allocation5 + $0x30] sm:$0xff]   ;;  %s325_s24 = smov [#allocation7]  }
  0x1d   :  { %218 = vmatprep.subr.bf16.mxu0 %v245_v0  ;;  %v247_v2 = vld [vmem:[#allocation5 + $0x28] sm:$0xff]   ;;  %v248_v3 = vld [vmem:[#allocation5 + $0x20] sm:$0xff]   ;;  %v253_v4 = vld [vmem:[#allocation2] sm:$0xff]   ;;  %s184_s25 = sshll.u32 %s325_s24, 4  ;;  %s185_s25 = int_to_ptr.vmem [resolvable:$true] %s184_s25 }
  0x1e   :  { %219 = vmatpush3.bf16.msra.mxu0 %v245_v0  ;;  %234 = vmatprep.mubr.bf16.mxu0 %v253_v4  ;;  %v249_v5 = vld [vmem:[#allocation5 + $0x18] sm:$0xff]   ;;  %v250_v6 = vld [vmem:[#allocation5 + $0x10] sm:$0xff]   ;;  %v251_v7 = vld [vmem:[#allocation5 + $0x8] sm:$0xff]   ;;  %s295_s26 = scalar_lea.vmem %s185_s25, 384  ;;  %p300_p11 = scmp.lt.s32.totalorder %s185_s25, %s185_s25 }
  0x1f   :  { %220 = vmatprep.subr.bf16.mxu0 %v246_v1  ;;  %v252_v8 = vld [vmem:[#allocation5] sm:$0xff]   ;;  %v254_v9 = vld [vmem:[#allocation2 + $0x8] ss:$0 sps:$4 sm:$0xff]   ;;  %v197_v10 = vld [vmem:[%s362_s2] ss:$0 sm:$0xff]  ;;  %p296_p10 = scmp.ne.s32.totalorder %s185_s25, %s295_s26  ;;  %p301_p12 = scmp.lt.s32.totalorder %s295_s26, %s295_s26 }
  0x21   :  { %p302_p13 = por %p301_p12, %p300_p11 }
  0x22   :  { %221 = vmatpush3.bf16.msra.mxu0 %v246_v1 }
  0x23   :  { %222 = vmatprep.subr.bf16.mxu0 %v247_v2  ;;  %p303_p0 = pnand %p302_p13, %p296_p10 }
  0x26   :  { %223 = vmatpush3.bf16.msra.mxu0 %v247_v2 }
  0x27   :  { %224 = vmatprep.subr.bf16.mxu0 %v248_v3 }
  0x2a   :  { %225 = vmatpush3.bf16.msra.mxu0 %v248_v3 }
  0x2b   :  { %226 = vmatprep.subr.bf16.mxu0 %v249_v5 }
  0x2e   :  { %227 = vmatpush3.bf16.msra.mxu0 %v249_v5 }
  0x2f   :  { %228 = vmatprep.subr.bf16.mxu0 %v250_v6 }
  0x32   :  { %229 = vmatpush3.bf16.msra.mxu0 %v250_v6 }
  0x33   :  { %230 = vmatprep.subr.bf16.mxu0 %v251_v7 }
  0x36   :  { %231 = vmatpush3.bf16.msra.mxu0 %v251_v7 }
  0x37   :  { %232 = vmatprep.subr.bf16.mxu0 %v252_v8 }
  0x3a   :  { %233 = vmatpush3.bf16.msra.mxu0 %v252_v8 }
  0x3d   :  { %235 = vmatmul.mubr.bf16.vlgmr.msra.gmra.mxu0 %v254_v9 }
  0xfd   :  { %v236_v11 = vpop.f32.mrf.mxu0 }
  0xfe   :  { %v171_v12 = vadd.f32 %v236_v11, %v197_v10 }
  0xff   :  { %v162_v13 = vpop.f32.mrf.mxu0 }
 0x100   :  { %178 = vst [vmem:[#allocation7 + $0x10] sm:$0xff] %v171_v12  ;;  %v163_v14 = vadd.f32 %v197_v10, %v162_v13 }
 0x101   :  { %v237_v15 = vpop.f32.mrf.mxu0 }
 0x102   :  { %176 = vst [vmem:[#allocation7] sm:$0xff] %v163_v14 }
 0x103   :  { %v165_v16 = vpop.f32.mrf.mxu0 }
 0x104   :  { %v166_v17 = vadd.f32 %v197_v10, %v165_v16 }
 0x106   :  { %177 = vst [vmem:[#allocation7 + $0x8] sm:$0xff] %v166_v17 }
 0x107   :  { %306 = shalt.err (!%p303_p0)
}
 0x108   :  { %s326_s2 = smov 128   ;;  %s327_s27 = smov 8  }
 0x109   :  { %190 = dma.vmem_to_hbm [thread:$0]  %s185_s25, 384, %s363_s3, [#allocation4], %s326_s2, %s326_s2, %s327_s27  }
 0x10a   :  { %319 = dma.done.wait [#allocation4], 384  }
 0x10b   :  { %320 = vsyncadd [#allocation4], 4294966912 }
 0x10c   :  { %194 = vsyncpa [#allocation3], 1 }
 0x10d   :  { %195 = vsyncpa [#allocation6], 1 }
 0x10e   :  { %196 = vsyncpa [#allocation4], 1 }

</bundles_post_ra>
